<compile_context>
chip_gen: v5e
topology: v5e:2x2
jax: 0.10.0
libtpu: 0.0.40
codegen_flags: <defaults>
</compile_context>

<pallas_src>
import jax
import jax.numpy as jnp
import numpy as np
from jax import lax
from jax.experimental import pallas as pl
from jax.experimental.pallas import tpu as pltpu

_VMEM_LIMIT = 32 * 1024 * 1024   # scoped budget honoured on v5e/v6e/v7x


def _target_block_bytes():
    # v7x: HBM ~3.2 TB/s, so a 2 MiB block streams in ~1-2 us and the ~0.35 us
    # per-grid-step overhead starts to show; 4 MiB halves it.  3 arrays x 2
    # buffers x 4 MiB = 24 MiB still fits the 32 MiB scoped budget (v7x VMEM is
    # 64 MiB/TC).  Keep 2 MiB on v5e/v6e where steps are already long.
    try:
        kind = jax.devices()[0].device_kind.lower()
    except Exception:
        kind = ""
    if "v7" in kind or "tpu7" in kind:
        return 4 * 1024 * 1024
    return 2 * 1024 * 1024


def _sublane_multiple(dtype):
    # 8 for f32, 16 for bf16, 32 for int8/fp8 (sub-32-bit packs along sublanes).
    return 8 * max(1, 4 // jnp.dtype(dtype).itemsize)


def _row_tile(n_rows, row_bytes, dtype, block_bytes):
    """Largest row tile (multiple of the dtype sublane count) <= block_bytes.

    Prefers a divisor of n_rows so there is no partial edge tile at all.
    """
    sub = _sublane_multiple(dtype)
    max_rows = max(sub, (block_bytes // max(1, row_bytes)) // sub * sub)
    if n_rows <= max_rows:
        return n_rows
    cand = max_rows
    while cand >= sub:
        if n_rows % cand == 0:
            return cand
        cand -= sub
    return max_rows


# ----------------------------------------------------------------------------
# Kernel A: per-batch streaming reduction -> (B, 8, 128) stats.
#   row 0: sum(text_b)  row 1: max(text_b)
#   row 2: sum(graph_b) row 3: max(graph_b)   (each broadcast across 128 lanes)
# Batch axis "parallel" (both v7x TCs), reduction axis "arbitrary".
# ----------------------------------------------------------------------------
def batch_stats_pallas(text, graph):
    B, S, E = text.shape
    blk = _target_block_bytes()
    ts = _row_tile(S, E * jnp.dtype(text.dtype).itemsize, text.dtype, blk)
    nk = pl.cdiv(S, ts)
    needs_mask = (S % ts) != 0

    def kernel(t_ref, g_ref, stats_ref, sum_t, max_t, sum_g, max_g):
        b = pl.program_id(0)
        k = pl.program_id(1)

        @pl.when(k == 0)
        def _():
            sum_t[b] = 0.0
            sum_g[b] = 0.0
            max_t[b] = -jnp.inf
            max_g[b] = -jnp.inf

        xt = t_ref[0].astype(jnp.float32)   # (ts, E)
        xg = g_ref[0].astype(jnp.float32)

        def accum(xt_s, xt_m, xg_s, xg_m):
            sum_t[b] = sum_t[b] + jnp.sum(xt_s)
            sum_g[b] = sum_g[b] + jnp.sum(xg_s)
            max_t[b] = jnp.maximum(max_t[b], jnp.max(xt_m))
            max_g[b] = jnp.maximum(max_g[b], jnp.max(xg_m))

        if not needs_mask:
            accum(xt, xt, xg, xg)
        else:
            # Only the last k tile is partial: interior tiles take the
            # unmasked fast path (no iota / where on the hot path).
            @pl.when(k < nk - 1)
            def _():
                accum(xt, xt, xg, xg)

            @pl.when(k == nk - 1)
            def _():
                rows_left = S - k * ts
                rid = lax.broadcasted_iota(jnp.int32, (ts, E), 0)
                valid = rid < rows_left
                accum(jnp.where(valid, xt, 0.0),
                      jnp.where(valid, xt, -jnp.inf),
                      jnp.where(valid, xg, 0.0),
                      jnp.where(valid, xg, -jnp.inf))

        # Per-batch epilogue: write this batch's 4 scalars (broadcast across
        # lanes) into its resident output block.  No cross-batch dependency,
        # so the b axis can be sharded across TensorCores safely.
        @pl.when(k == nk - 1)
        def _():
            stats_ref[0, 0:1, :] = jnp.full((1, 128), sum_t[b], jnp.float32)
            stats_ref[0, 1:2, :] = jnp.full((1, 128), max_t[b], jnp.float32)
            stats_ref[0, 2:3, :] = jnp.full((1, 128), sum_g[b], jnp.float32)
            stats_ref[0, 3:4, :] = jnp.full((1, 128), max_g[b], jnp.float32)
            stats_ref[0, 4:8, :] = jnp.zeros((4, 128), jnp.float32)

    return pl.pallas_call(
        kernel,
        out_shape=jax.ShapeDtypeStruct((B, 8, 128), jnp.float32),
        grid=(B, nk),
        in_specs=[
            pl.BlockSpec((1, ts, E), lambda b, k: (b, k, 0)),
            pl.BlockSpec((1, ts, E), lambda b, k: (b, k, 0)),
        ],
        out_specs=pl.BlockSpec((1, 8, 128), lambda b, k: (b, 0, 0)),
        scratch_shapes=[pltpu.SMEM((B,), jnp.float32) for _ in range(4)],
        compiler_params=pltpu.CompilerParams(
            dimension_semantics=("parallel", "arbitrary"),
            vmem_limit_bytes=_VMEM_LIMIT),
    )(text, graph)


# ----------------------------------------------------------------------------
# Kernel B: scalar attention chain (prologue) + fused elementwise hot path
#   out = text*(1+norm_tf) + graph*(1+norm_gf)   on a flattened (B*S, E) view.
# ----------------------------------------------------------------------------
def fused_scale_pallas(text, graph, stats, params_vec):
    B, S, E = text.shape
    rows = B * S
    inv_n = 1.0 / float(S * E)
    inv_b = 1.0 / float(B)

    # Metadata-only reshapes (row-major contiguous): no HBM copies, no padding.
    t2 = text.reshape(rows, E)
    g2 = graph.reshape(rows, E)

    blk = _target_block_bytes()
    tr = _row_tile(rows, E * jnp.dtype(text.dtype).itemsize, text.dtype, blk)
    grid = (pl.cdiv(rows, tr),)

    def kernel(p_ref, stats_ref, t_ref, g_ref, o_ref):
        # --- prologue: whole scalar attention chain (~O(B) scalar ops, cheap
        #     to recompute per step / per core; keeps scales out of HBM) -----
        w_avg, b_avg = p_ref[0], p_ref[1]
        w_max, b_max = p_ref[2], p_ref[3]
        w_sp_avg, w_sp_max, b_sp = p_ref[4], p_ref[5], p_ref[6]

        def stat(bb, j):
            # Stats rows hold a scalar broadcast across all 128 lanes, so a
            # lane max recovers it without a VMEM scalar load.
            return jnp.max(stats_ref[bb, j:j + 1, :])

        # channel_attention on text / graph (1x1 conv == scalar affine + ReLU).
        tf_c, gf_c = [], []
        for bb in range(B):
            mean_t = stat(bb, 0) * inv_n
            mx_t = stat(bb, 1)
            mean_g = stat(bb, 2) * inv_n
            mx_g = stat(bb, 3)
            tf_c.append(jnp.maximum(w_avg * mean_t + b_avg, 0.0)
                        + jnp.maximum(w_max * mx_t + b_max, 0.0))
            gf_c.append(jnp.maximum(w_avg * mean_g + b_avg, 0.0)
                        + jnp.maximum(w_max * mx_g + b_max, 0.0))

        # Cross attention between (B,1,1) tensors: softmax over a singleton
        # axis is exactly 1; `cross*0 + 1` reproduces that (incl. NaN/Inf
        # propagation) without a scalar transcendental.
        tf_cw, gf_cw = [], []
        for bb in range(B):
            one = tf_c[bb] * gf_c[bb] * 0.0 + 1.0
            tf_cw.append(one * tf_c[bb])
            gf_cw.append(one * gf_c[bb])

        # spatial_attention: mean/max over batch + centre tap of the 7x7 conv
        # + ReLU, then softmax over a singleton axis (== 1).
        def spatial_norm(vals):
            s_sum = vals[0]
            s_max = vals[0]
            for v in vals[1:]:
                s_sum = s_sum + v
                s_max = jnp.maximum(s_max, v)
            s_att = jnp.maximum(
                w_sp_avg * (s_sum * inv_b) + w_sp_max * s_max + b_sp, 0.0)
            return s_att * 0.0 + 1.0   # softmax over singleton dim

        scale_t = (1.0 + spatial_norm(tf_cw)).astype(t_ref.dtype)
        scale_g = (1.0 + spatial_norm(gf_cw)).astype(g_ref.dtype)

        # --- elementwise hot path (3 VPU ops / element): tf_fused + gf_fused
        o_ref[...] = (t_ref[...] * scale_t + g_ref[...] * scale_g).astype(o_ref.dtype)

    out = pl.pallas_call(
        kernel,
        out_shape=jax.ShapeDtypeStruct((rows, E), text.dtype),
        grid=grid,
        in_specs=[
            pl.BlockSpec(memory_space=pltpu.MemorySpace.SMEM),   # params (7,)
            pl.BlockSpec((B, 8, 128), lambda i: (0, 0, 0)),      # stats, resident
            pl.BlockSpec((tr, E), lambda i: (i, 0)),
            pl.BlockSpec((tr, E), lambda i: (i, 0)),
        ],
        out_specs=pl.BlockSpec((tr, E), lambda i: (i, 0)),
        compiler_params=pltpu.CompilerParams(
            dimension_semantics=("parallel",),   # shards across v7x's 2 TCs
            vmem_limit_bytes=_VMEM_LIMIT),
    )(params_vec, stats, t2, g2)

    return out.reshape(B, S, E)


# ----------------------------------------------------------------------------
# Parameters (deterministic init; shapes match the nn.Module __init__)
# ----------------------------------------------------------------------------
def init_params(key):
    k1, k2, k3, k4, k5, k6 = jax.random.split(key, 6)
    return {
        "avg_w": jax.random.normal(k1, (1, 1, 1, 1), jnp.float32) * 0.5,  # avg_conv.weight
        "avg_b": jax.random.normal(k2, (1,), jnp.float32) * 0.1,          # avg_conv.bias
        "max_w": jax.random.normal(k3, (1, 1, 1, 1), jnp.float32) * 0.5,  # max_conv.weight
        "max_b": jax.random.normal(k4, (1,), jnp.float32) * 0.1,          # max_conv.bias
        "sp_w": jax.random.normal(k5, (1, 2, 7, 7), jnp.float32) * 0.1,   # spatial_conv.weight
        "sp_b": jax.random.normal(k6, (1,), jnp.float32) * 0.1,           # spatial_conv.bias
    }


# ----------------------------------------------------------------------------
# Full forward pass: two Pallas calls, no XLA glue between them.
# ----------------------------------------------------------------------------
def kaca_forward(params, text_feature, graph_feature):
    # Only these scalars of the conv weights are ever touched by the module's
    # attention chain (1x1 convs + centre tap of the 7x7 conv).
    p = jnp.stack([
        params["avg_w"][0, 0, 0, 0], params["avg_b"][0],
        params["max_w"][0, 0, 0, 0], params["max_b"][0],
        params["sp_w"][0, 0, 3, 3], params["sp_w"][0, 1, 3, 3],
        params["sp_b"][0],
    ]).astype(jnp.float32)

    stats = batch_stats_pallas(text_feature, graph_feature)
    return fused_scale_pallas(text_feature, graph_feature, stats, p)


if __name__ == "__main__":
    key = jax.random.PRNGKey(0)
    kp, kt, kg = jax.random.split(key, 3)
    params = init_params(kp)

    B, S, E = 2, 8, 256
    text = jax.random.normal(kt, (B, S, E), jnp.float32)
    graph = jax.random.normal(kg, (B, S, E), jnp.float32)

    out = jax.jit(kaca_forward)(params, text, graph)
    out = jax.block_until_ready(out)

    # Reference: every softmax in the module's attention chain is over a
    # singleton axis -> norm_tf == norm_gf == 1 for finite inputs, so the
    # pre-ESA fused output equals 2*(text + graph).
    ref = 2.0 * (text + graph)
    assert out.shape == (B, S, E)
    np.testing.assert_allclose(np.asarray(out), np.asarray(ref),
                               rtol=1e-5, atol=1e-5)
    print("KERNEL_OK")
</pallas_src>

<mosaic_0001>
module attributes {stable_mosaic.version = 11 : i64} {
  func.func @kernel(%arg0: i32, %arg1: i32, %arg2: memref<1x8x256xf32, #tpu.memory_space<vmem>>, %arg3: memref<1x8x256xf32, #tpu.memory_space<vmem>>, %arg4: memref<1x8x128xf32, #tpu.memory_space<vmem>>, %arg5: memref<2xf32, #tpu.memory_space<smem>>, %arg6: memref<2xf32, #tpu.memory_space<smem>>, %arg7: memref<2xf32, #tpu.memory_space<smem>>, %arg8: memref<2xf32, #tpu.memory_space<smem>>) attributes {dimension_semantics = [#tpu.dimension_semantics<parallel>, #tpu.dimension_semantics<arbitrary>], iteration_bounds = array<i64: 2, 1>, scalar_prefetch = 0 : i64, scratch_operands = 4 : i64, tpu.core_type = #tpu.core_type<tc>, window_params = [{transform_indices = @transform_0, window_bounds = array<i64: 1, 8, 256>}, {transform_indices = @transform_1, window_bounds = array<i64: 1, 8, 256>}, {transform_indices = @transform_2, window_bounds = array<i64: 1, 8, 128>}]} {
    %c0_i32 = arith.constant 0 : i32
    %0 = arith.cmpi eq, %arg1, %c0_i32 : i32
    %1 = arith.extui %0 : i1 to i32
    %c0_i32_0 = arith.constant 0 : i32
    %2 = arith.cmpi ne, %1, %c0_i32_0 : i32
    scf.if %2 {
      %cst_11 = arith.constant 0.000000e+00 : f32
      %46 = arith.index_cast %arg0 : i32 to index
      %47 = memref.load %arg5[%46] : memref<2xf32, #tpu.memory_space<smem>>
      memref.store %cst_11, %arg5[%46] : memref<2xf32, #tpu.memory_space<smem>>
      %cst_12 = arith.constant 0.000000e+00 : f32
      %48 = arith.index_cast %arg0 : i32 to index
      %49 = memref.load %arg7[%48] : memref<2xf32, #tpu.memory_space<smem>>
      memref.store %cst_12, %arg7[%48] : memref<2xf32, #tpu.memory_space<smem>>
      %cst_13 = arith.constant 0xFF800000 : f32
      %50 = arith.index_cast %arg0 : i32 to index
      %51 = memref.load %arg6[%50] : memref<2xf32, #tpu.memory_space<smem>>
      memref.store %cst_13, %arg6[%50] : memref<2xf32, #tpu.memory_space<smem>>
      %cst_14 = arith.constant 0xFF800000 : f32
      %52 = arith.index_cast %arg0 : i32 to index
      %53 = memref.load %arg8[%52] : memref<2xf32, #tpu.memory_space<smem>>
      memref.store %cst_14, %arg8[%52] : memref<2xf32, #tpu.memory_space<smem>>
    } else {
    }
    %c0 = arith.constant 0 : index
    %c0_1 = arith.constant 0 : index
    %c0_2 = arith.constant 0 : index
    %3 = vector.load %arg2[%c0, %c0_1, %c0_2] : memref<1x8x256xf32, #tpu.memory_space<vmem>>, vector<1x8x256xf32>
    %4 = vector.shape_cast %3 : vector<1x8x256xf32> to vector<8x256xf32>
    %c0_3 = arith.constant 0 : index
    %c0_4 = arith.constant 0 : index
    %c0_5 = arith.constant 0 : index
    %5 = vector.load %arg3[%c0_3, %c0_4, %c0_5] : memref<1x8x256xf32, #tpu.memory_space<vmem>>, vector<1x8x256xf32>
    %6 = vector.shape_cast %5 : vector<1x8x256xf32> to vector<8x256xf32>
    %7 = arith.index_cast %arg0 : i32 to index
    %8 = memref.load %arg5[%7] : memref<2xf32, #tpu.memory_space<smem>>
    %9 = vector.shape_cast %4 : vector<8x256xf32> to vector<1x8x256xf32>
    %cst = arith.constant dense<0.000000e+00> : vector<1xf32>
    %10 = vector.multi_reduction <add>, %9, %cst [1, 2] : vector<1x8x256xf32> to vector<1xf32>
    %11 = vector.shape_cast %10 : vector<1xf32> to vector<1x1x1xf32>
    %12 = vector.extract %11[0, 0, 0] : f32 from vector<1x1x1xf32>
    %13 = arith.addf %8, %12 : f32
    %14 = arith.index_cast %arg0 : i32 to index
    %15 = memref.load %arg5[%14] : memref<2xf32, #tpu.memory_space<smem>>
    memref.store %13, %arg5[%14] : memref<2xf32, #tpu.memory_space<smem>>
    %16 = arith.index_cast %arg0 : i32 to index
    %17 = memref.load %arg7[%16] : memref<2xf32, #tpu.memory_space<smem>>
    %18 = vector.shape_cast %6 : vector<8x256xf32> to vector<1x8x256xf32>
    %cst_6 = arith.constant dense<0.000000e+00> : vector<1xf32>
    %19 = vector.multi_reduction <add>, %18, %cst_6 [1, 2] : vector<1x8x256xf32> to vector<1xf32>
    %20 = vector.shape_cast %19 : vector<1xf32> to vector<1x1x1xf32>
    %21 = vector.extract %20[0, 0, 0] : f32 from vector<1x1x1xf32>
    %22 = arith.addf %17, %21 : f32
    %23 = arith.index_cast %arg0 : i32 to index
    %24 = memref.load %arg7[%23] : memref<2xf32, #tpu.memory_space<smem>>
    memref.store %22, %arg7[%23] : memref<2xf32, #tpu.memory_space<smem>>
    %25 = arith.index_cast %arg0 : i32 to index
    %26 = memref.load %arg6[%25] : memref<2xf32, #tpu.memory_space<smem>>
    %27 = vector.shape_cast %4 : vector<8x256xf32> to vector<1x8x256xf32>
    %cst_7 = arith.constant dense<0xFF800000> : vector<1xf32>
    %28 = vector.multi_reduction <maximumf>, %27, %cst_7 [1, 2] : vector<1x8x256xf32> to vector<1xf32>
    %29 = vector.shape_cast %28 : vector<1xf32> to vector<1x1x1xf32>
    %30 = vector.extract %29[0, 0, 0] : f32 from vector<1x1x1xf32>
    %31 = arith.maximumf %26, %30 : f32
    %32 = arith.index_cast %arg0 : i32 to index
    %33 = memref.load %arg6[%32] : memref<2xf32, #tpu.memory_space<smem>>
    memref.store %31, %arg6[%32] : memref<2xf32, #tpu.memory_space<smem>>
    %34 = arith.index_cast %arg0 : i32 to index
    %35 = memref.load %arg8[%34] : memref<2xf32, #tpu.memory_space<smem>>
    %36 = vector.shape_cast %6 : vector<8x256xf32> to vector<1x8x256xf32>
    %cst_8 = arith.constant dense<0xFF800000> : vector<1xf32>
    %37 = vector.multi_reduction <maximumf>, %36, %cst_8 [1, 2] : vector<1x8x256xf32> to vector<1xf32>
    %38 = vector.shape_cast %37 : vector<1xf32> to vector<1x1x1xf32>
    %39 = vector.extract %38[0, 0, 0] : f32 from vector<1x1x1xf32>
    %40 = arith.maximumf %35, %39 : f32
    %41 = arith.index_cast %arg0 : i32 to index
    %42 = memref.load %arg8[%41] : memref<2xf32, #tpu.memory_space<smem>>
    memref.store %40, %arg8[%41] : memref<2xf32, #tpu.memory_space<smem>>
    %c0_i32_9 = arith.constant 0 : i32
    %43 = arith.cmpi eq, %arg1, %c0_i32_9 : i32
    %44 = arith.extui %43 : i1 to i32
    %c0_i32_10 = arith.constant 0 : i32
    %45 = arith.cmpi ne, %44, %c0_i32_10 : i32
    scf.if %45 {
      %46 = arith.index_cast %arg0 : i32 to index
      %47 = memref.load %arg5[%46] : memref<2xf32, #tpu.memory_space<smem>>
      %48 = vector.broadcast %47 : f32 to vector<1x128xf32>
      %c0_11 = arith.constant 0 : index
      %c0_12 = arith.constant 0 : index
      %c0_13 = arith.constant 0 : index
      %49 = vector.load %arg4[%c0_11, %c0_12, %c0_13] : memref<1x8x128xf32, #tpu.memory_space<vmem>>, vector<1x1x128xf32>
      %50 = vector.shape_cast %49 : vector<1x1x128xf32> to vector<1x128xf32>
      %51 = vector.shape_cast %48 : vector<1x128xf32> to vector<1x1x128xf32>
      tpu.vector_store %arg4[%c0_11, %c0_12, %c0_13], %51 {strides = array<i32>} : memref<1x8x128xf32, #tpu.memory_space<vmem>>, vector<1x1x128xf32>,
      %52 = arith.index_cast %arg0 : i32 to index
      %53 = memref.load %arg6[%52] : memref<2xf32, #tpu.memory_space<smem>>
      %54 = vector.broadcast %53 : f32 to vector<1x128xf32>
      %c0_14 = arith.constant 0 : index
      %c1 = arith.constant 1 : index
      %c0_15 = arith.constant 0 : index
      %55 = vector.load %arg4[%c0_14, %c1, %c0_15] : memref<1x8x128xf32, #tpu.memory_space<vmem>>, vector<1x1x128xf32>
      %56 = vector.shape_cast %55 : vector<1x1x128xf32> to vector<1x128xf32>
      %57 = vector.shape_cast %54 : vector<1x128xf32> to vector<1x1x128xf32>
      tpu.vector_store %arg4[%c0_14, %c1, %c0_15], %57 {strides = array<i32>} : memref<1x8x128xf32, #tpu.memory_space<vmem>>, vector<1x1x128xf32>,
      %58 = arith.index_cast %arg0 : i32 to index
      %59 = memref.load %arg7[%58] : memref<2xf32, #tpu.memory_space<smem>>
      %60 = vector.broadcast %59 : f32 to vector<1x128xf32>
      %c0_16 = arith.constant 0 : index
      %c2 = arith.constant 2 : index
      %c0_17 = arith.constant 0 : index
      %61 = vector.load %arg4[%c0_16, %c2, %c0_17] : memref<1x8x128xf32, #tpu.memory_space<vmem>>, vector<1x1x128xf32>
      %62 = vector.shape_cast %61 : vector<1x1x128xf32> to vector<1x128xf32>
      %63 = vector.shape_cast %60 : vector<1x128xf32> to vector<1x1x128xf32>
      tpu.vector_store %arg4[%c0_16, %c2, %c0_17], %63 {strides = array<i32>} : memref<1x8x128xf32, #tpu.memory_space<vmem>>, vector<1x1x128xf32>,
      %64 = arith.index_cast %arg0 : i32 to index
      %65 = memref.load %arg8[%64] : memref<2xf32, #tpu.memory_space<smem>>
      %66 = vector.broadcast %65 : f32 to vector<1x128xf32>
      %c0_18 = arith.constant 0 : index
      %c3 = arith.constant 3 : index
      %c0_19 = arith.constant 0 : index
      %67 = vector.load %arg4[%c0_18, %c3, %c0_19] : memref<1x8x128xf32, #tpu.memory_space<vmem>>, vector<1x1x128xf32>
      %68 = vector.shape_cast %67 : vector<1x1x128xf32> to vector<1x128xf32>
      %69 = vector.shape_cast %66 : vector<1x128xf32> to vector<1x1x128xf32>
      tpu.vector_store %arg4[%c0_18, %c3, %c0_19], %69 {strides = array<i32>} : memref<1x8x128xf32, #tpu.memory_space<vmem>>, vector<1x1x128xf32>,
      %cst_20 = arith.constant 0.000000e+00 : f32
      %70 = vector.broadcast %cst_20 : f32 to vector<4x128xf32>
      %c0_21 = arith.constant 0 : index
      %c4 = arith.constant 4 : index
      %c0_22 = arith.constant 0 : index
      %71 = vector.load %arg4[%c0_21, %c4, %c0_22] : memref<1x8x128xf32, #tpu.memory_space<vmem>>, vector<1x4x128xf32>
      %72 = vector.shape_cast %71 : vector<1x4x128xf32> to vector<4x128xf32>
      %73 = vector.shape_cast %70 : vector<4x128xf32> to vector<1x4x128xf32>
      tpu.vector_store %arg4[%c0_21, %c4, %c0_22], %73 {strides = array<i32>} : memref<1x8x128xf32, #tpu.memory_space<vmem>>, vector<1x4x128xf32>,
    } else {
    }
    return
  }
  func.func @transform_0(%arg0: i32, %arg1: i32) -> (i32, i32, i32) {
    %c0_i32 = arith.constant 0 : i32
    %c0_i32_0 = arith.constant 0 : i32
    return %arg0, %arg1, %c0_i32 : i32, i32, i32
  }
  func.func @transform_1(%arg0: i32, %arg1: i32) -> (i32, i32, i32) {
    %c0_i32 = arith.constant 0 : i32
    %c0_i32_0 = arith.constant 0 : i32
    return %arg0, %arg1, %c0_i32 : i32, i32, i32
  }
  func.func @transform_2(%arg0: i32, %arg1: i32) -> (i32, i32, i32) {
    %c0_i32 = arith.constant 0 : i32
    %c0_i32_0 = arith.constant 0 : i32
    %c0_i32_1 = arith.constant 0 : i32
    return %arg0, %c0_i32, %c0_i32_0 : i32, i32, i32
  }
}

module attributes {stable_mosaic.version = 11 : i64} {
  func.func @kernel(%arg0: i32, %arg1: memref<7xf32, #tpu.memory_space<smem>>, %arg2: memref<2x8x128xf32, #tpu.memory_space<vmem>>, %arg3: memref<16x256xf32, #tpu.memory_space<vmem>>, %arg4: memref<16x256xf32, #tpu.memory_space<vmem>>, %arg5: memref<16x256xf32, #tpu.memory_space<vmem>>) attributes {dimension_semantics = [#tpu.dimension_semantics<parallel>], iteration_bounds = array<i64: 1>, scalar_prefetch = 0 : i64, scratch_operands = 0 : i64, tpu.core_type = #tpu.core_type<tc>, window_params = [{transform_indices = @transform_0, window_bounds = array<i64: 7>}, {pipeline_mode = #tpu.pipeline_mode<synchronous>, transform_indices = @transform_1, window_bounds = array<i64: 2, 8, 128>}, {transform_indices = @transform_2, window_bounds = array<i64: 16, 256>}, {transform_indices = @transform_3, window_bounds = array<i64: 16, 256>}, {transform_indices = @transform_4, window_bounds = array<i64: 16, 256>}]} {
    %c0 = arith.constant 0 : index
    %0 = memref.load %arg1[%c0] : memref<7xf32, #tpu.memory_space<smem>>
    %c1 = arith.constant 1 : index
    %1 = memref.load %arg1[%c1] : memref<7xf32, #tpu.memory_space<smem>>
    %c2 = arith.constant 2 : index
    %2 = memref.load %arg1[%c2] : memref<7xf32, #tpu.memory_space<smem>>
    %c3 = arith.constant 3 : index
    %3 = memref.load %arg1[%c3] : memref<7xf32, #tpu.memory_space<smem>>
    %c4 = arith.constant 4 : index
    %4 = memref.load %arg1[%c4] : memref<7xf32, #tpu.memory_space<smem>>
    %c5 = arith.constant 5 : index
    %5 = memref.load %arg1[%c5] : memref<7xf32, #tpu.memory_space<smem>>
    %c6 = arith.constant 6 : index
    %6 = memref.load %arg1[%c6] : memref<7xf32, #tpu.memory_space<smem>>
    %c0_0 = arith.constant 0 : index
    %c0_1 = arith.constant 0 : index
    %c0_2 = arith.constant 0 : index
    %7 = vector.load %arg2[%c0_0, %c0_1, %c0_2] : memref<2x8x128xf32, #tpu.memory_space<vmem>>, vector<1x1x128xf32>
    %8 = vector.shape_cast %7 : vector<1x1x128xf32> to vector<1x128xf32>
    %9 = vector.shape_cast %8 : vector<1x128xf32> to vector<1x1x128xf32>
    %cst = arith.constant dense<0xFF800000> : vector<1xf32>
    %10 = vector.multi_reduction <maximumf>, %9, %cst [1, 2] : vector<1x1x128xf32> to vector<1xf32>
    %11 = vector.shape_cast %10 : vector<1xf32> to vector<1x1x1xf32>
    %12 = vector.extract %11[0, 0, 0] : f32 from vector<1x1x1xf32>
    %cst_3 = arith.constant 4.8828125E-4 : f32
    %13 = arith.mulf %12, %cst_3 : f32
    %c0_4 = arith.constant 0 : index
    %c1_5 = arith.constant 1 : index
    %c0_6 = arith.constant 0 : index
    %14 = vector.load %arg2[%c0_4, %c1_5, %c0_6] : memref<2x8x128xf32, #tpu.memory_space<vmem>>, vector<1x1x128xf32>
    %15 = vector.shape_cast %14 : vector<1x1x128xf32> to vector<1x128xf32>
    %16 = vector.shape_cast %15 : vector<1x128xf32> to vector<1x1x128xf32>
    %cst_7 = arith.constant dense<0xFF800000> : vector<1xf32>
    %17 = vector.multi_reduction <maximumf>, %16, %cst_7 [1, 2] : vector<1x1x128xf32> to vector<1xf32>
    %18 = vector.shape_cast %17 : vector<1xf32> to vector<1x1x1xf32>
    %19 = vector.extract %18[0, 0, 0] : f32 from vector<1x1x1xf32>
    %c0_8 = arith.constant 0 : index
    %c2_9 = arith.constant 2 : index
    %c0_10 = arith.constant 0 : index
    %20 = vector.load %arg2[%c0_8, %c2_9, %c0_10] : memref<2x8x128xf32, #tpu.memory_space<vmem>>, vector<1x1x128xf32>
    %21 = vector.shape_cast %20 : vector<1x1x128xf32> to vector<1x128xf32>
    %22 = vector.shape_cast %21 : vector<1x128xf32> to vector<1x1x128xf32>
    %cst_11 = arith.constant dense<0xFF800000> : vector<1xf32>
    %23 = vector.multi_reduction <maximumf>, %22, %cst_11 [1, 2] : vector<1x1x128xf32> to vector<1xf32>
    %24 = vector.shape_cast %23 : vector<1xf32> to vector<1x1x1xf32>
    %25 = vector.extract %24[0, 0, 0] : f32 from vector<1x1x1xf32>
    %cst_12 = arith.constant 4.8828125E-4 : f32
    %26 = arith.mulf %25, %cst_12 : f32
    %c0_13 = arith.constant 0 : index
    %c3_14 = arith.constant 3 : index
    %c0_15 = arith.constant 0 : index
    %27 = vector.load %arg2[%c0_13, %c3_14, %c0_15] : memref<2x8x128xf32, #tpu.memory_space<vmem>>, vector<1x1x128xf32>
    %28 = vector.shape_cast %27 : vector<1x1x128xf32> to vector<1x128xf32>
    %29 = vector.shape_cast %28 : vector<1x128xf32> to vector<1x1x128xf32>
    %cst_16 = arith.constant dense<0xFF800000> : vector<1xf32>
    %30 = vector.multi_reduction <maximumf>, %29, %cst_16 [1, 2] : vector<1x1x128xf32> to vector<1xf32>
    %31 = vector.shape_cast %30 : vector<1xf32> to vector<1x1x1xf32>
    %32 = vector.extract %31[0, 0, 0] : f32 from vector<1x1x1xf32>
    %33 = arith.mulf %0, %13 : f32
    %34 = arith.addf %33, %1 : f32
    %cst_17 = arith.constant 0.000000e+00 : f32
    %35 = arith.maximumf %34, %cst_17 : f32
    %36 = arith.mulf %2, %19 : f32
    %37 = arith.addf %36, %3 : f32
    %cst_18 = arith.constant 0.000000e+00 : f32
    %38 = arith.maximumf %37, %cst_18 : f32
    %39 = arith.addf %35, %38 : f32
    %40 = arith.mulf %0, %26 : f32
    %41 = arith.addf %40, %1 : f32
    %cst_19 = arith.constant 0.000000e+00 : f32
    %42 = arith.maximumf %41, %cst_19 : f32
    %43 = arith.mulf %2, %32 : f32
    %44 = arith.addf %43, %3 : f32
    %cst_20 = arith.constant 0.000000e+00 : f32
    %45 = arith.maximumf %44, %cst_20 : f32
    %46 = arith.addf %42, %45 : f32
    %c1_21 = arith.constant 1 : index
    %c0_22 = arith.constant 0 : index
    %c0_23 = arith.constant 0 : index
    %47 = vector.load %arg2[%c1_21, %c0_22, %c0_23] : memref<2x8x128xf32, #tpu.memory_space<vmem>>, vector<1x1x128xf32>
    %48 = vector.shape_cast %47 : vector<1x1x128xf32> to vector<1x128xf32>
    %49 = vector.shape_cast %48 : vector<1x128xf32> to vector<1x1x128xf32>
    %cst_24 = arith.constant dense<0xFF800000> : vector<1xf32>
    %50 = vector.multi_reduction <maximumf>, %49, %cst_24 [1, 2] : vector<1x1x128xf32> to vector<1xf32>
    %51 = vector.shape_cast %50 : vector<1xf32> to vector<1x1x1xf32>
    %52 = vector.extract %51[0, 0, 0] : f32 from vector<1x1x1xf32>
    %cst_25 = arith.constant 4.8828125E-4 : f32
    %53 = arith.mulf %52, %cst_25 : f32
    %c1_26 = arith.constant 1 : index
    %c1_27 = arith.constant 1 : index
    %c0_28 = arith.constant 0 : index
    %54 = vector.load %arg2[%c1_26, %c1_27, %c0_28] : memref<2x8x128xf32, #tpu.memory_space<vmem>>, vector<1x1x128xf32>
    %55 = vector.shape_cast %54 : vector<1x1x128xf32> to vector<1x128xf32>
    %56 = vector.shape_cast %55 : vector<1x128xf32> to vector<1x1x128xf32>
    %cst_29 = arith.constant dense<0xFF800000> : vector<1xf32>
    %57 = vector.multi_reduction <maximumf>, %56, %cst_29 [1, 2] : vector<1x1x128xf32> to vector<1xf32>
    %58 = vector.shape_cast %57 : vector<1xf32> to vector<1x1x1xf32>
    %59 = vector.extract %58[0, 0, 0] : f32 from vector<1x1x1xf32>
    %c1_30 = arith.constant 1 : index
    %c2_31 = arith.constant 2 : index
    %c0_32 = arith.constant 0 : index
    %60 = vector.load %arg2[%c1_30, %c2_31, %c0_32] : memref<2x8x128xf32, #tpu.memory_space<vmem>>, vector<1x1x128xf32>
    %61 = vector.shape_cast %60 : vector<1x1x128xf32> to vector<1x128xf32>
    %62 = vector.shape_cast %61 : vector<1x128xf32> to vector<1x1x128xf32>
    %cst_33 = arith.constant dense<0xFF800000> : vector<1xf32>
    %63 = vector.multi_reduction <maximumf>, %62, %cst_33 [1, 2] : vector<1x1x128xf32> to vector<1xf32>
    %64 = vector.shape_cast %63 : vector<1xf32> to vector<1x1x1xf32>
    %65 = vector.extract %64[0, 0, 0] : f32 from vector<1x1x1xf32>
    %cst_34 = arith.constant 4.8828125E-4 : f32
    %66 = arith.mulf %65, %cst_34 : f32
    %c1_35 = arith.constant 1 : index
    %c3_36 = arith.constant 3 : index
    %c0_37 = arith.constant 0 : index
    %67 = vector.load %arg2[%c1_35, %c3_36, %c0_37] : memref<2x8x128xf32, #tpu.memory_space<vmem>>, vector<1x1x128xf32>
    %68 = vector.shape_cast %67 : vector<1x1x128xf32> to vector<1x128xf32>
    %69 = vector.shape_cast %68 : vector<1x128xf32> to vector<1x1x128xf32>
    %cst_38 = arith.constant dense<0xFF800000> : vector<1xf32>
    %70 = vector.multi_reduction <maximumf>, %69, %cst_38 [1, 2] : vector<1x1x128xf32> to vector<1xf32>
    %71 = vector.shape_cast %70 : vector<1xf32> to vector<1x1x1xf32>
    %72 = vector.extract %71[0, 0, 0] : f32 from vector<1x1x1xf32>
    %73 = arith.mulf %0, %53 : f32
    %74 = arith.addf %73, %1 : f32
    %cst_39 = arith.constant 0.000000e+00 : f32
    %75 = arith.maximumf %74, %cst_39 : f32
    %76 = arith.mulf %2, %59 : f32
    %77 = arith.addf %76, %3 : f32
    %cst_40 = arith.constant 0.000000e+00 : f32
    %78 = arith.maximumf %77, %cst_40 : f32
    %79 = arith.addf %75, %78 : f32
    %80 = arith.mulf %0, %66 : f32
    %81 = arith.addf %80, %1 : f32
    %cst_41 = arith.constant 0.000000e+00 : f32
    %82 = arith.maximumf %81, %cst_41 : f32
    %83 = arith.mulf %2, %72 : f32
    %84 = arith.addf %83, %3 : f32
    %cst_42 = arith.constant 0.000000e+00 : f32
    %85 = arith.maximumf %84, %cst_42 : f32
    %86 = arith.addf %82, %85 : f32
    %87 = arith.mulf %39, %46 : f32
    %cst_43 = arith.constant 0.000000e+00 : f32
    %88 = arith.mulf %87, %cst_43 : f32
    %cst_44 = arith.constant 1.000000e+00 : f32
    %89 = arith.addf %88, %cst_44 : f32
    %90 = arith.mulf %89, %39 : f32
    %91 = arith.mulf %89, %46 : f32
    %92 = arith.mulf %79, %86 : f32
    %cst_45 = arith.constant 0.000000e+00 : f32
    %93 = arith.mulf %92, %cst_45 : f32
    %cst_46 = arith.constant 1.000000e+00 : f32
    %94 = arith.addf %93, %cst_46 : f32
    %95 = arith.mulf %94, %79 : f32
    %96 = arith.mulf %94, %86 : f32
    %97 = arith.addf %90, %95 : f32
    %98 = arith.maximumf %90, %95 : f32
    %cst_47 = arith.constant 5.000000e-01 : f32
    %99 = arith.mulf %97, %cst_47 : f32
    %100 = arith.mulf %4, %99 : f32
    %101 = arith.mulf %5, %98 : f32
    %102 = arith.addf %100, %101 : f32
    %103 = arith.addf %102, %6 : f32
    %cst_48 = arith.constant 0.000000e+00 : f32
    %104 = arith.maximumf %103, %cst_48 : f32
    %cst_49 = arith.constant 0.000000e+00 : f32
    %105 = arith.mulf %104, %cst_49 : f32
    %cst_50 = arith.constant 1.000000e+00 : f32
    %106 = arith.addf %105, %cst_50 : f32
    %cst_51 = arith.constant 1.000000e+00 : f32
    %107 = arith.addf %cst_51, %106 : f32
    %108 = arith.addf %91, %96 : f32
    %109 = arith.maximumf %91, %96 : f32
    %cst_52 = arith.constant 5.000000e-01 : f32
    %110 = arith.mulf %108, %cst_52 : f32
    %111 = arith.mulf %4, %110 : f32
    %112 = arith.mulf %5, %109 : f32
    %113 = arith.addf %111, %112 : f32
    %114 = arith.addf %113, %6 : f32
    %cst_53 = arith.constant 0.000000e+00 : f32
    %115 = arith.maximumf %114, %cst_53 : f32
    %cst_54 = arith.constant 0.000000e+00 : f32
    %116 = arith.mulf %115, %cst_54 : f32
    %cst_55 = arith.constant 1.000000e+00 : f32
    %117 = arith.addf %116, %cst_55 : f32
    %cst_56 = arith.constant 1.000000e+00 : f32
    %118 = arith.addf %cst_56, %117 : f32
    %c0_57 = arith.constant 0 : index
    %c0_58 = arith.constant 0 : index
    %119 = vector.load %arg3[%c0_57, %c0_58] : memref<16x256xf32, #tpu.memory_space<vmem>>, vector<16x256xf32>
    %120 = vector.broadcast %107 : f32 to vector<16x256xf32>
    %121 = arith.mulf %119, %120 : vector<16x256xf32>
    %c0_59 = arith.constant 0 : index
    %c0_60 = arith.constant 0 : index
    %122 = vector.load %arg4[%c0_59, %c0_60] : memref<16x256xf32, #tpu.memory_space<vmem>>, vector<16x256xf32>
    %123 = vector.broadcast %118 : f32 to vector<16x256xf32>
    %124 = arith.mulf %122, %123 : vector<16x256xf32>
    %125 = arith.addf %121, %124 : vector<16x256xf32>
    %c0_61 = arith.constant 0 : index
    %c0_62 = arith.constant 0 : index
    %126 = vector.load %arg5[%c0_61, %c0_62] : memref<16x256xf32, #tpu.memory_space<vmem>>, vector<16x256xf32>
    tpu.vector_store %arg5[%c0_61, %c0_62], %125 {strides = array<i32>} : memref<16x256xf32, #tpu.memory_space<vmem>>, vector<16x256xf32>,
    return
  }
  func.func @transform_0(%arg0: i32) -> i32 {
    %c0_i32 = arith.constant 0 : i32
    %c0_i32_0 = arith.constant 0 : i32
    return %c0_i32 : i32
  }
  func.func @transform_1(%arg0: i32) -> (i32, i32, i32) {
    %c0_i32 = arith.constant 0 : i32
    %c0_i32_0 = arith.constant 0 : i32
    %c0_i32_1 = arith.constant 0 : i32
    %c0_i32_2 = arith.constant 0 : i32
    return %c0_i32, %c0_i32_0, %c0_i32_1 : i32, i32, i32
  }
  func.func @transform_2(%arg0: i32) -> (i32, i32) {
    %c0_i32 = arith.constant 0 : i32
    %c0_i32_0 = arith.constant 0 : i32
    return %arg0, %c0_i32 : i32, i32
  }
  func.func @transform_3(%arg0: i32) -> (i32, i32) {
    %c0_i32 = arith.constant 0 : i32
    %c0_i32_0 = arith.constant 0 : i32
    return %arg0, %c0_i32 : i32, i32
  }
  func.func @transform_4(%arg0: i32) -> (i32, i32) {
    %c0_i32 = arith.constant 0 : i32
    %c0_i32_0 = arith.constant 0 : i32
    return %arg0, %c0_i32 : i32, i32
  }
}

</mosaic_0001>

<bundles_post_ra>
// kernel: kaca_forward.2
= control target key start
LH: loop header
LB: loop body
LE: loop exit
PB: predicated region body
PF: predicated region fallthrough
CT: control target
= control target key end

     0   :  { %7 = vsyncpa [#allocation7], 0  ;;  %s773_s0 = inlined_call_operand.hbm [shape: f32[2,8,256], index: 0, kind: input, shape index: {}]   ;;  %s774_s1 = inlined_call_operand.hbm [shape: f32[2,8,256], index: 1, kind: input, shape index: {}]   ;;  %s775_s2 = inlined_call_operand.vmem [shape: f32[2,8,128], index: 2, kind: output, shape index: {}]  }
   0x1   :  { %9 = vsyncpa [#allocation7 + $0x1], 0 }
   0x2   :  { %10 = vsyncpa [#allocation9], 0 }
   0x3   :  { %12 = vsyncpa [#allocation9 + $0x1], 0  ;;  %s643_s9 = smov 0   ;;  %s645_s10 = smov 0  }
   0x4   :  { %s647_s11 = smov 0   ;;  %s649_s12 = smov 0  }
   0x5   :  { %s651_s13 = smov 0   ;;  %s653_s14 = smov 0  }
   0x6 LB: > { %s420_s15 = sadd.s32 4294967295, %s623_s14   ;;  %s30_s16 = sadd.s32 1, %s619_s13  ;;  %s623_s14 = sphi %s653_s14, %s18_s14   ;;  %s619_s13 = sphi %s651_s13, %s782_s13   ;;  %s615_s12 = sphi %s649_s12, %s781_s12   ;;  %s611_s11 = sphi %s647_s11, %s780_s11   ;;  %s607_s10 = sphi %s645_s10, %s779_s10   ;;  %s603_s9 = sphi %s643_s9, %s778_s9  }
   0x7   : > { %p32_p0 = scmp.ge.s32.totalorder %s30_s16, 2  ;;  %s39_s17 = sadd.s32 1, %s611_s11 }
   0x8   : > { %p46_p1 = scmp.ne.s32.totalorder %s611_s11, %s607_s10  ;;  %p47_p2 = scmp.eq.s32.totalorder %s623_s14, 0 }
   0x9   : > { %s784_s16 = smov (%p32_p0, %s30_s16), 0  ;;  %p52_p4 = scmp.ne.s32.totalorder %s607_s10, %s603_s9 }
   0xa   : > { %p679_p3 = por %p47_p2, %p46_p1  ;;  %s34_s19 = ssub.s32 %s619_s13, %s784_s16 }
   0xb   : > { %p53_p5 = scmp.eq.s32.totalorder %s420_s15, 0  ;;  %p37_p6 = scmp.eq.s32.totalorder %s34_s19, 0 }
   0xc   : > { %p457_p8 = scmp.lt.s32.totalorder %s623_s14, 2  ;;  %s130_s22 = sand.u32 1, %s611_s11  }
   0xd   : > { %p686_p7 = por %p53_p5, %p52_p4  ;;  %s436_s23 = sshll.u32 %s619_s13, 4 }
   0xe   : > { %s692_s21 = scalar_select %p37_p6, %s611_s11, %s39_s17  }
   0xf   : > { %s424_s24 = sshll.u32 %s130_s22, 4  ;;  %s141_s27 = scalar_lea.hbm %s773_s0, %s436_s23 }
  0x10   : > { %s143_s28 = sshll.u32 %s141_s27, 4  ;;  %s134_s29 = scalar_lea.vmem [#allocation6], %s424_s24  ;;  %s144_s28 = int_to_ptr.hbm [resolvable:$true] %s143_s28 }
  0x11   : > { %s145_s30 = sshll.u32 %s134_s29, 4  ;;  %p451_p9 = pnand %p457_p8, %p679_p3  ;;  %s146_s30 = int_to_ptr.vmem [resolvable:$true] %s145_s30 }
  0x12   : > { %p430_p10 = scmp.ge.s32.totalorder %s623_s14, 1  ;;  %p172_p11 = scmp.lt.s32.totalorder %s623_s14, 3 }
  0x13   : > { %s131_s3 = scalar_lea.sflag [#allocation7], %s130_s22  ;;  %s163_s6 = scalar_lea.hbm %s774_s1, %s436_s23 }
  0x14   : > { %453 = dma.hbm_to_vmem [thread:$0]  (!%p451_p9), %s144_s28, 256, %s146_s30, %s131_s3  }
  0x15   : > { %p173_p12 = pnand %p430_p10, %p172_p11  ;;  %s165_s7 = sshll.u32 %s163_s6, 4  ;;  %s166_s7 = int_to_ptr.hbm [resolvable:$true] %s165_s7 }
  0x16   : > { %s156_s8 = scalar_lea.vmem [#allocation8], %s424_s24  ;;  %s153_s15 = scalar_lea.sflag [#allocation9], %s130_s22 }
  0x17   : > { %s167_s9 = sshll.u32 %s156_s8, 4  ;;  %176 = sbr.rel (%p173_p12) target bundleno = 235 (0xeb), region = 28  ;;  %s168_s9 = int_to_ptr.vmem [resolvable:$true] %s167_s9 }
  0x18   : > { %456 = dma.hbm_to_vmem [thread:$0]  (!%p451_p9), %s166_s7, 256, %s168_s9, %s153_s15  }
  0x19   : > { %s178_s17 = sand.u32 (!%p173_p12), 1, %s607_s10  }
  0x1a   : > { %s431_s18 = sshll.u32 (!%p173_p12), %s178_s17, 4  ;;  %s179_s19 = scalar_lea.sflag (!%p173_p12), [#allocation7], %s178_s17 }
  0x1b   : > { %s182_s25 = scalar_lea.vmem (!%p173_p12), [#allocation6], %s431_s18 }
  0x1c   : > { %594 = dma.done.wait (%p686_p7), %s179_s19, 256  }
  0x1d   : > { %596 = vsyncadd (%p686_p7), %s179_s19, 4294967040  ;;  %s189_s23 = scalar_lea.sflag [#allocation9], %s178_s17  ;;  %s192_s24 = scalar_lea.vmem [#allocation8], %s431_s18 }
  0x1e   : > { %598 = dma.done.wait (%p686_p7), %s189_s23, 256  }
  0x1f   : > { %600 = vsyncadd (%p686_p7), %s189_s23, 4294967040  ;;  %v234_v0 = vld [vmem:[%s182_s25] sm:$0xff]  ;;  %v235_v1 = vld [vmem:[%s182_s25 + $0x8] sm:$0xff]  ;;  %s226_s20 = scalar_lea.smem [#allocation2], %s615_s12  ;;  %s625_s22 = smov 0.0   ;;  %v627_v36 = vmov 0.0  }
  0x20   : > { %v267_v2 = vmax.f32 %v234_v0, %v235_v1  ;;  %v239_v3 = vadd.f32 %v235_v1, %v234_v0  ;;  %v236_v4 = vld [vmem:[%s192_s24] sm:$0xff]  ;;  %v237_v5 = vld [vmem:[%s192_s24 + $0x8] sm:$0xff]  ;;  %227 = sst [smem:[%s226_s20]] %s625_s22  ;;  %s228_s26 = scalar_lea.smem [#allocation4], %s615_s12 }
  0x21   : > { %v281_v6 = vmax.f32 %v236_v4, %v237_v5  ;;  %v253_v7 = vadd.f32 %v237_v5, %v236_v4  ;;  %229 = sst [smem:[%s228_s26]] %s625_s22  ;;  %s230_s27 = scalar_lea.smem [#allocation3], %s615_s12 }
  0x22   : > { %268 = vmax.xlane.f32.xlu1 %v267_v2  ;;  %240 = vadd.xlane.f32.xlu0 %v239_v3  ;;  %s626_s28 = smov -inf   ;;  %s232_s29 = scalar_lea.smem [#allocation5], %s615_s12 }
  0x23   : > { %231 = sst [smem:[%s230_s27]] %s626_s28  ;;  %p218_p13 = scmp.lt.s32.totalorder %s615_s12, 1 }
  0x24   : > { %233 = sst [smem:[%s232_s29]] %s626_s28 }
  0x25   : > { %s219_s30 = scalar_select %p218_p13, %s615_s12, 1 }
  0x26   : > { %s238_s7 = sld [smem:[#allocation2 + %s615_s12]] }
  0x27   : > { %s433_s3 = sshll.u32 %s219_s30, 3  ;;  %s252_s8 = sld [smem:[#allocation4 + %s615_s12]] }
  0x28   : > { %s732_s6 = scalar_lea.vmem %s775_s2, %s433_s3  ;;  %s266_s15 = sld [smem:[#allocation3 + %s615_s12]] }
  0x29   : > { %309 = vst [vmem:[%s732_s6 + $0x4] sm:$0xf] %v627_v36  ;;  %s280_s18 = sld [smem:[#allocation5 + %s615_s12]] }
  0x2a   : > { %282 = vmax.xlane.f32.xlu1 %v281_v6  ;;  %254 = vadd.xlane.f32.xlu0 %v253_v7 }
  0x95   : > { %v269_v8 = vpop.xlane.xlu1 %268  ;;  %v241_v9 = vpop.xlane.xlu0 %240 }
  0x96   : > { %v270_v10 = vrot.slane %v269_v8, 4  ;;  %v242_v11 = vrot.slane %v241_v9, 4 }
  0x98   : > { %v243_v12 = vadd.f32 %v242_v11, %v241_v9  ;;  %v271_v13 = vmax.f32 %v269_v8, %v270_v10 }
  0x9a   : > { %v244_v14 = vrot.slane %v243_v12, 2  ;;  %v272_v16 = vrot.slane %v271_v13, 2 }
  0x9c   : > { %v245_v15 = vadd.f32 %v244_v14, %v243_v12  ;;  %v273_v25 = vmax.f32 %v271_v13, %v272_v16 }
  0x9d   : > { %v283_v17 = vpop.xlane.xlu1 %282  ;;  %v255_v18 = vpop.xlane.xlu0 %254 }
  0x9e   : > { %v284_v19 = vrot.slane %v283_v17, 4  ;;  %v256_v20 = vrot.slane %v255_v18, 4  ;;  %v246_v21 = vrot.slane %v245_v15, 1  ;;  %v274_v30 = vrot.slane %v273_v25, 1 }
  0xa0   : > { %v285_v22 = vmax.f32 %v283_v17, %v284_v19  ;;  %v257_v23 = vadd.f32 %v256_v20, %v255_v18  ;;  %v247_v24 = vadd.f32 %v246_v21, %v245_v15  ;;  %v275_v35 = vmax.f32 %v273_v25, %v274_v30 }
  0xa2   : > { %v286_v26 = vrot.slane %v285_v22, 2  ;;  %v258_v27 = vrot.slane %v257_v23, 2  ;;  %438 = vpush %v247_v24 }
  0xa4   : > { %v287_v28 = vmax.f32 %v285_v22, %v286_v26  ;;  %v259_v29 = vadd.f32 %v258_v27, %v257_v23 }
  0xa6   : > { %v260_v31 = vrot.slane %v259_v29, 1  ;;  %v288_v32 = vrot.slane %v287_v28, 1 }
  0xa8   : > { %v261_v33 = vadd.f32 %v260_v31, %v259_v29  ;;  %v289_v34 = vmax.f32 %v287_v28, %v288_v32 }
  0xaa   : > { %440 = vpush %v261_v33 }
  0xab   : > { %442 = vpush %v275_v35 }
  0xac   : > { %444 = vpush %v289_v34 }
  0xd3   : > { %s439_s9 = spop %438 }
  0xd4   : > { %s249_s17 = sadd.f32 %s439_s9, %s238_s7 }
  0xd6   : > { %251 = sst [smem:[%s226_s20]] %s249_s17 }
  0xd7   : > { %s297_s19 = sld [smem:[#allocation2 + %s615_s12]] }
  0xdb   : > { %s441_s25 = spop %440 }
  0xdc   : > { %s263_s23 = sadd.f32 %s441_s25, %s252_s8  ;;  %s443_s24 = spop %442 }
  0xdd   : > { %v298_v37 = vstv %s297_s19  ;;  %s277_s22 = smax.f32 %s443_s24, %s266_s15  ;;  %s445_s28 = spop %444 }
  0xde   : > { %299 = vst [vmem:[%s732_s6] sm:$0x1] %v298_v37  ;;  %265 = sst [smem:[%s228_s26]] %s263_s23  ;;  %s291_s3 = smax.f32 %s445_s28, %s280_s18 }
  0xdf   : > { %s303_s30 = sld [smem:[#allocation4 + %s615_s12]] }
  0xe0   : > { %279 = sst [smem:[%s230_s27]] %s277_s22 }
  0xe1   : > { %s300_s4 = sld [smem:[#allocation3 + %s615_s12]] }
  0xe2   : > { %293 = sst [smem:[%s232_s29]] %s291_s3 }
  0xe3   : > { %s306_s20 = sld [smem:[#allocation5 + %s615_s12]] }
  0xe5   : > { %v304_v38 = vstv %s303_s30 }
  0xe6   : > { %305 = vst [vmem:[%s732_s6 + $0x2] sm:$0x1] %v304_v38 }
  0xe7   : > { %v301_v39 = vstv %s300_s4 }
  0xe8   : > { %302 = vst [vmem:[%s732_s6 + $0x1] sm:$0x1] %v301_v39 }
  0xe9   : > { %v307_v40 = vstv %s306_s20 }
  0xea   : > { %308 = vst [vmem:[%s732_s6 + $0x3] sm:$0x1] %v307_v40 }
  0xeb PF: > { %s18_s14 = sadd.s32 1, %s623_s14   ;;  %s778_s9 = smov %s607_s10 }
  0xec   : > { %p15_p0 = scmp.ge.s32.totalorder %s18_s14, 4   ;;  %s779_s10 = smov %s611_s11 }
  0xed   : > { %s780_s11 = smov %s692_s21  ;;  %s781_s12 = smov %s619_s13 }
  0xee   : > { %s782_s13 = smov %s784_s16  ;;  %17 = sbr.rel (!%p15_p0) target bundleno = 6 (0x6), region = 97 }
  0xf3   :  { %329 = vsyncpa [#allocation7], 1 }
  0xf4   :  { %331 = vsyncpa [#allocation7 + $0x1], 1 }
  0xf5   :  { %332 = vsyncpa [#allocation9], 1 }
  0xf6   :  { %334 = vsyncpa [#allocation9 + $0x1], 1 }

// kernel: kaca_forward.3
= control target key start
LH: loop header
LB: loop body
LE: loop exit
PB: predicated region body
PF: predicated region fallthrough
CT: control target
= control target key end

     0   :  { %9 = vsyncpa [#allocation5], 0  ;;  %s480_s0 = inlined_call_operand.vmem [shape: f32[7], index: 0, kind: input, shape index: {}]   ;;  %s481_s1 = inlined_call_operand.vmem [shape: f32[2,8,128], index: 1, kind: input, shape index: {}]   ;;  %s482_s2 = inlined_call_operand.hbm [shape: f32[16,256], index: 2, kind: input, shape index: {}]   ;;  %s483_s3 = inlined_call_operand.vmem [shape: f32[16,256], index: 3, kind: input, shape index: {}]   ;;  %s484_s4 = inlined_call_operand.hbm [shape: f32[16,256], index: 4, kind: output, shape index: {}]  }
   0x1   :  { %10 = vsyncpa [#allocation3], 0 }
   0x2   :  { %11 = vsyncpa [#allocation4], 0  ;;  %s17_s17 = sshll.u32 %s480_s0, 4  ;;  %s27_s20 = sshll.u32 %s482_s2, 4  ;;  %s18_s17 = int_to_ptr.vmem [resolvable:$true] %s17_s17  ;;  %s28_s20 = int_to_ptr.hbm [resolvable:$true] %s27_s20 }
   0x3   :  { %s352_s21 = smov [#allocation2]   ;;  %s353_s22 = smov [#allocation6]  }
   0x4   :  { %20 = dma.vmem_to_smem %s18_s17, 16, %s352_s21, [#allocation5]  }
   0x5   :  { %s29_s23 = sshll.u32 %s353_s22, 4  ;;  %s485_s24 = smov 256   ;;  %s30_s23 = int_to_ptr.vmem [resolvable:$true] %s29_s23 }
   0x6   :  { %s355_s25 = smov 16  }
   0x7   :  { %35 = dma.hbm_to_vmem [thread:$0]  %s28_s20, 512, %s30_s23, [#allocation3], %s485_s24, %s485_s24, %s355_s25  }
   0x8   :  { %346 = dma.done.wait [#allocation5], 16  }
   0x9   :  { %347 = vsyncadd [#allocation5], 4294967280 }
   0xa   :  { %348 = dma.done.wait [#allocation3], 512  }
   0xb   :  { %349 = vsyncadd [#allocation3], 4294966784 }
   0xc   :  { %46 = sfence }
   0xd   :  { %vm55_vm0 = vcmask 1040384   ;;  %v78_v0 = vld [vmem:[%s481_s1 + $0x2] sm:$0x1]  ;;  %v54_v1 = vld [vmem:[%s481_s1] sm:$0x1]  ;;  %s426_s14 = sld [smem:[#allocation2 + $0x1]] }
   0xe   :  { %v79_v2 = vsel %vm55_vm0, %v78_v0, -inf  ;;  %v56_v3 = vsel %vm55_vm0, %v54_v1, -inf  ;;  %v260_v4 = vld [vmem:[%s481_s1 + $0x8] sm:$0x1]  ;;  %v90_v6 = vld [vmem:[%s481_s1 + $0x3] sm:$0x1] }
   0xf   :  { %80 = vmax.xlane.f32.xlu1 %v79_v2  ;;  %57 = vmax.xlane.f32.xlu0 %v56_v3  ;;  %v117_v5 = vsel %vm55_vm0, %v260_v4, -inf  ;;  %v67_v7 = vld [vmem:[%s481_s1 + $0x1] sm:$0x1]  ;;  %v261_v8 = vld [vmem:[%s481_s1 + $0x9] sm:$0x1]  ;;  %v91_v9 = vsel %vm55_vm0, %v90_v6, -inf }
  0x10   :  { %118 = vmax.xlane.f32.xlu2 %v117_v5  ;;  %v68_v10 = vsel %vm55_vm0, %v67_v7, -inf  ;;  %v129_v11 = vsel %vm55_vm0, %v261_v8, -inf  ;;  %v263_v12 = vld [vmem:[%s481_s1 + $0xb] sm:$0x1]  ;;  %v262_v13 = vld [vmem:[%s481_s1 + $0xa] sm:$0x1] }
  0x11   :  { %v152_v14 = vsel %vm55_vm0, %v263_v12, -inf  ;;  %v140_v15 = vsel %vm55_vm0, %v262_v13, -inf  ;;  %s424_s1 = sld [smem:[#allocation2]]  ;;  %s356_s22 = smov 0.0   ;;  %v208_v8 = vld [vmem:[#allocation6] sm:$0xff] }
  0x12   :  { %s428_s17 = sld [smem:[#allocation2 + $0x2]]  ;;  %v217_v13 = vld [vmem:[%s483_s3] sm:$0xff] }
  0x13   :  { %s431_s19 = sld [smem:[#allocation2 + $0x3]] }
  0x17   :  { %92 = vmax.xlane.f32.xlu1 %v91_v9  ;;  %69 = vmax.xlane.f32.xlu0 %v68_v10  ;;  %v209_v9 = vld [vmem:[#allocation6 + $0x8] sm:$0xff]  ;;  %v210_v10 = vld [vmem:[#allocation6 + $0x10] sm:$0xff] }
  0x18   :  { %130 = vmax.xlane.f32.xlu2 %v129_v11  ;;  %v211_v11 = vld [vmem:[#allocation6 + $0x18] sm:$0xff] }
  0x1f   :  { %153 = vmax.xlane.f32.xlu1 %v152_v14  ;;  %141 = vmax.xlane.f32.xlu0 %v140_v15  ;;  %v218_v14 = vld [vmem:[%s483_s3 + $0x8] sm:$0xff]  ;;  %v219_v15 = vld [vmem:[%s483_s3 + $0x10] sm:$0xff] }
  0x82   :  { %v81_v16 = vpop.xlane.xlu1 %80  ;;  %v58_v17 = vpop.xlane.xlu0 %57 }
  0x83   :  { %v82_v18 = vrot.slane %v81_v16, 4  ;;  %v59_v19 = vrot.slane %v58_v17, 4  ;;  %v119_v20 = vpop.xlane.xlu2 %118 }
  0x84   :  { %v120_v21 = vrot.slane %v119_v20, 4 }
  0x85   :  { %v60_v22 = vmax.f32 %v58_v17, %v59_v19  ;;  %v83_v23 = vmax.f32 %v81_v16, %v82_v18  ;;  %v220_v16 = vld [vmem:[%s483_s3 + $0x18] sm:$0xff]  ;;  %s486_s3 = smov 256  }
  0x86   :  { %v121_v25 = vmax.f32 %v119_v20, %v120_v21 }
  0x87   :  { %v61_v24 = vrot.slane %v60_v22, 2  ;;  %v84_v27 = vrot.slane %v83_v23, 2 }
  0x88   :  { %v122_v34 = vrot.slane %v121_v25, 2 }
  0x89   :  { %v62_v26 = vmax.f32 %v60_v22, %v61_v24  ;;  %v85_v40 = vmax.f32 %v83_v23, %v84_v27 }
  0x8a   :  { %v93_v28 = vpop.xlane.xlu1 %92  ;;  %v70_v29 = vpop.xlane.xlu0 %69  ;;  %v123_v44 = vmax.f32 %v121_v25, %v122_v34 }
  0x8b   :  { %v94_v30 = vrot.slane %v93_v28, 4  ;;  %v71_v31 = vrot.slane %v70_v29, 4  ;;  %v131_v32 = vpop.xlane.xlu2 %130  ;;  %v63_v33 = vrot.slane %v62_v26, 1  ;;  %v86_v50 = vrot.slane %v85_v40, 1 }
  0x8c   :  { %v132_v35 = vrot.slane %v131_v32, 4  ;;  %v124_v55 = vrot.slane %v123_v44, 1 }
  0x8d   :  { %v95_v36 = vmax.f32 %v93_v28, %v94_v30  ;;  %v72_v37 = vmax.f32 %v70_v29, %v71_v31  ;;  %v64_v38 = vmax.f32 %v62_v26, %v63_v33  ;;  %v87_v61 = vmax.f32 %v85_v40, %v86_v50 }
  0x8e   :  { %v133_v39 = vmax.f32 %v131_v32, %v132_v35  ;;  %v125_v1 = vmax.f32 %v123_v44, %v124_v55 }
  0x8f   :  { %v96_v41 = vrot.slane %v95_v36, 2  ;;  %v73_v42 = vrot.slane %v72_v37, 2  ;;  %264 = vpush %v64_v38 }
  0x90   :  { %v134_v43 = vrot.slane %v133_v39, 2 }
  0x91   :  { %v74_v45 = vmax.f32 %v72_v37, %v73_v42  ;;  %v97_v46 = vmax.f32 %v95_v36, %v96_v41 }
  0x92   :  { %v135_v47 = vmax.f32 %v133_v39, %v134_v43  ;;  %v154_v48 = vpop.xlane.xlu1 %153  ;;  %v142_v49 = vpop.xlane.xlu0 %141 }
  0x93   :  { %v155_v51 = vrot.slane %v154_v48, 4  ;;  %v143_v52 = vrot.slane %v142_v49, 4  ;;  %v75_v53 = vrot.slane %v74_v45, 1  ;;  %v98_v54 = vrot.slane %v97_v46, 1 }
  0x94   :  { %v136_v56 = vrot.slane %v135_v47, 1 }
  0x95   :  { %v156_v57 = vmax.f32 %v154_v48, %v155_v51  ;;  %v144_v58 = vmax.f32 %v142_v49, %v143_v52  ;;  %v76_v59 = vmax.f32 %v74_v45, %v75_v53  ;;  %v99_v60 = vmax.f32 %v97_v46, %v98_v54 }
  0x96   :  { %v137_v0 = vmax.f32 %v135_v47, %v136_v56 }
  0x97   :  { %v157_v62 = vrot.slane %v156_v57, 2  ;;  %v145_v63 = vrot.slane %v144_v58, 2  ;;  %266 = vpush %v76_v59 }
  0x98   :  { %268 = vpush %v87_v61 }
  0x99   :  { %v158_v2 = vmax.f32 %v156_v57, %v157_v62  ;;  %v146_v3 = vmax.f32 %v144_v58, %v145_v63  ;;  %270 = vpush %v99_v60 }
  0x9a   :  { %272 = vpush %v125_v1 }
  0x9b   :  { %274 = vpush %v137_v0  ;;  %v147_v4 = vrot.slane %v146_v3, 1  ;;  %v159_v5 = vrot.slane %v158_v2, 1 }
  0x9d   :  { %v148_v6 = vmax.f32 %v146_v3, %v147_v4  ;;  %v160_v7 = vmax.f32 %v158_v2, %v159_v5 }
  0x9f   :  { %276 = vpush %v148_v6 }
  0xa0   :  { %278 = vpush %v160_v7 }
  0xc0   :  { %s265_s15 = spop %264 }
  0xc1   :  { %s66_s16 = smul.f32 0.00048828125, %s265_s15 }
  0xc3   :  { %s101_s18 = smul.f32 %s66_s16, %s424_s1 }
  0xc5   :  { %s102_s20 = sadd.f32 %s426_s14, %s101_s18 }
  0xc7   :  { %s103_s23 = smax.f32 %s356_s22, %s102_s20 }
  0xc8   :  { %s267_s21 = spop %266 }
  0xc9   :  { %s104_s0 = smul.f32 %s267_s21, %s428_s17  ;;  %s269_s2 = spop %268 }
  0xca   :  { %s89_s26 = smul.f32 0.00048828125, %s269_s2  ;;  %s271_s27 = spop %270 }
  0xcb   :  { %s105_s28 = sadd.f32 %s431_s19, %s104_s0  ;;  %s111_s29 = smul.f32 %s271_s27, %s428_s17 }
  0xcc   :  { %s108_s30 = smul.f32 %s89_s26, %s424_s1  ;;  %s273_s5 = spop %272 }
  0xcd   :  { %s106_s6 = smax.f32 %s356_s22, %s105_s28  ;;  %s112_s7 = sadd.f32 %s431_s19, %s111_s29 }
  0xce   :  { %s441_s8 = sadd.f32 %s106_s6, %s103_s23  ;;  %s127_s9 = smul.f32 0.00048828125, %s273_s5 }
  0xcf   :  { %s109_s10 = sadd.f32 %s426_s14, %s108_s30  ;;  %s275_s12 = spop %274 }
  0xd0   :  { %s162_s11 = smul.f32 %s127_s9, %s424_s1  ;;  %s113_s16 = smax.f32 %s356_s22, %s112_s7 }
  0xd1   :  { %s110_s13 = smax.f32 %s356_s22, %s109_s10  ;;  %s165_s15 = smul.f32 %s275_s12, %s428_s17 }
  0xd2   :  { %s277_s18 = spop %276  ;;  %s114_s20 = sadd.f32 %s113_s16, %s110_s13 }
  0xd3   :  { %s150_s21 = smul.f32 0.00048828125, %s277_s18  ;;  %s163_s0 = sadd.f32 %s426_s14, %s162_s11 }
  0xd4   :  { %s166_s2 = sadd.f32 %s431_s19, %s165_s15  ;;  %s176_s26 = smul.f32 %s114_s20, %s441_s8 }
  0xd5   :  { %s169_s23 = smul.f32 %s150_s21, %s424_s1  ;;  %s279_s27 = spop %278 }
  0xd6   :  { %s164_s28 = smax.f32 %s356_s22, %s163_s0  ;;  %s172_s29 = smul.f32 %s279_s27, %s428_s17 }
  0xd7   :  { %s167_s30 = smax.f32 %s356_s22, %s166_s2  ;;  %s170_s5 = sadd.f32 %s426_s14, %s169_s23 }
  0xd8   :  { %s173_s6 = sadd.f32 %s431_s19, %s172_s29  ;;  %s177_s9 = smul.f32 0.0, %s176_s26 }
  0xd9   :  { %s171_s10 = smax.f32 %s356_s22, %s170_s5  ;;  %s168_s7 = sadd.f32 %s167_s30, %s164_s28 }
  0xda   :  { %s174_s12 = smax.f32 %s356_s22, %s173_s6  ;;  %s178_s11 = sadd.f32 1.0, %s177_s9 }
  0xdb   :  { %s175_s13 = sadd.f32 %s174_s12, %s171_s10 }
  0xdc   :  { %s258_s1 = sld [smem:[#allocation2 + $0x5]]  ;;  %s179_s21 = smul.f32 %s178_s11, %s441_s8 }
  0xdd   :  { %s181_s15 = smul.f32 %s175_s13, %s168_s7  ;;  %s257_s18 = sld [smem:[#allocation2 + $0x4]] }
  0xde   :  { %s180_s0 = smul.f32 %s178_s11, %s114_s20  ;;  %s259_s27 = sld [smem:[#allocation2 + $0x6]] }
  0xdf   :  { %s182_s16 = smul.f32 0.0, %s181_s15 }
  0xe1   :  { %s183_s24 = sadd.f32 1.0, %s182_s16 }
  0xe3   :  { %s184_s17 = smul.f32 %s183_s24, %s168_s7 }
  0xe4   :  { %s185_s2 = smul.f32 %s183_s24, %s175_s13 }
  0xe5   :  { %s186_s14 = sadd.f32 %s184_s17, %s179_s21  ;;  %s187_s19 = smax.f32 %s184_s17, %s179_s21 }
  0xe6   :  { %s190_s23 = smul.f32 %s258_s1, %s187_s19  ;;  %s197_s26 = sadd.f32 %s185_s2, %s180_s0 }
  0xe7   :  { %s188_s29 = smul.f32 0.5, %s186_s14  ;;  %s198_s5 = smax.f32 %s185_s2, %s180_s0 }
  0xe8   :  { %s199_s28 = smul.f32 0.5, %s197_s26 }
  0xe9   :  { %s189_s30 = smul.f32 %s257_s18, %s188_s29 }
  0xea   :  { %s200_s6 = smul.f32 %s257_s18, %s199_s28 }
  0xeb   :  { %s191_s9 = sadd.f32 %s190_s23, %s189_s30  ;;  %s201_s10 = smul.f32 %s258_s1, %s198_s5 }
  0xec   :  { %s357_s23 = smov [#allocation7]   ;;  %s240_s30 = sshll.u32 %s484_s4, 4  ;;  %s241_s30 = int_to_ptr.hbm [resolvable:$true] %s240_s30 }
  0xed   :  { %s192_s12 = sadd.f32 %s259_s27, %s191_s9  ;;  %s238_s26 = sshll.u32 %s357_s23, 4  ;;  %s239_s26 = int_to_ptr.vmem [resolvable:$true] %s238_s26 }
  0xee   :  { %s202_s15 = sadd.f32 %s201_s10, %s200_s6 }
  0xef   :  { %s193_s8 = smax.f32 %s356_s22, %s192_s12 }
  0xf0   :  { %s203_s16 = sadd.f32 %s259_s27, %s202_s15  ;;  %s194_s20 = smul.f32 0.0, %s193_s8 }
  0xf2   :  { %s204_s7 = smax.f32 %s356_s22, %s203_s16  ;;  %s195_s24 = sadd.f32 1.0, %s194_s20 }
  0xf3   :  { %s205_s13 = smul.f32 0.0, %s204_s7 }
  0xf4   :  { %s196_s11 = sadd.f32 1.0, %s195_s24 }
  0xf5   :  { %s206_s21 = sadd.f32 1.0, %s205_s13 }
  0xf6   :  { %v212_v12 = vstv %s196_s11 }
  0xf7   :  { %s207_s1 = sadd.f32 1.0, %s206_s21  ;;  %v213_v17 = vmul.f32 %v212_v12, %v208_v8  ;;  %v214_v18 = vmul.f32 %v212_v12, %v209_v9  ;;  %v215_v19 = vmul.f32 %v212_v12, %v210_v10  ;;  %v216_v20 = vmul.f32 %v212_v12, %v211_v11 }
  0xf9   :  { %v221_v21 = vstv %s207_s1 }
  0xfa   :  { %v222_v22 = vmul.f32 %v221_v21, %v217_v13  ;;  %v223_v23 = vmul.f32 %v221_v21, %v218_v14  ;;  %v224_v24 = vmul.f32 %v221_v21, %v219_v15  ;;  %v225_v25 = vmul.f32 %v221_v21, %v220_v16 }
  0xfc   :  { %v226_v26 = vadd.f32 %v222_v22, %v213_v17  ;;  %v227_v27 = vadd.f32 %v223_v23, %v214_v18  ;;  %v228_v28 = vadd.f32 %v224_v24, %v215_v19  ;;  %v229_v29 = vadd.f32 %v225_v25, %v216_v20 }
  0xfe   :  { %230 = vst [vmem:[#allocation7] sm:$0xff] %v226_v26 }
  0xff   :  { %231 = vst [vmem:[#allocation7 + $0x8] sm:$0xff] %v227_v27 }
 0x100   :  { %232 = vst [vmem:[#allocation7 + $0x10] sm:$0xff] %v228_v28 }
 0x101   :  { %233 = vst [vmem:[#allocation7 + $0x18] sm:$0xff] %v229_v29 }
 0x102   :  { %246 = dma.vmem_to_hbm [thread:$0]  %s239_s26, 512, %s241_s30, [#allocation4], %s486_s3, %s486_s3, %s355_s25  }
 0x103   :  { %350 = dma.done.wait [#allocation4], 512  }
 0x104   :  { %351 = vsyncadd [#allocation4], 4294966784 }
 0x105   :  { %251 = vsyncpa [#allocation3], 1 }
 0x106   :  { %252 = vsyncpa [#allocation4], 1 }
 0x107   :  { %253 = vsyncpa [#allocation5], 1 }

</bundles_post_ra>
